<compile_context>
chip_gen: v7x
topology: tpu7x:2x2x1
jax: 0.10.0
libtpu: 0.0.40
codegen_flags: <defaults>
</compile_context>

<pallas_src>
import jax
import jax.numpy as jnp
from jax.experimental import pallas as pl
from jax.experimental.pallas import tpu as pltpu

LANE = 128
SUBLANE = 8


def _round_up(x, m):
    return (x + m - 1) // m * m


# ---------------------------------------------------------------------------
# Kernel
# ---------------------------------------------------------------------------
def deal_predictor_kernel(x_ref, addr_ref, w0_ref, w2b_ref, wh_ref, b_ref,
                          out_ref):
    f32 = jnp.float32
    cdt = w0_ref.dtype                      # compute dtype (e.g. bf16)
    c_out = out_ref.shape[1]

    x = x_ref[...].astype(cdt)              # (tb, c_in)   cast in-kernel
    addr = addr_ref[...]                    # (tb, a_dim)  f32
    b = b_ref[...]                          # (8, P)       f32 bias rows

    # layers[0]: Linear(in_channels, hidden)
    h = jnp.dot(x, w0_ref[...], preferred_element_type=f32) + b[0:1, :]

    # torch.cat([h, addr], dim=1) followed by layers[1]: ReLU
    # (applied per concat part; exact because ReLU is elementwise)
    h = jnp.maximum(h, 0.0).astype(cdt)
    a = jnp.maximum(addr, 0.0).astype(cdt)

    # layers[2] + layers[3] (no ReLU in between): folded offline.
    # wh_ref[0] = W2a @ W3, w2b_ref = W2b @ W3, b[1] = b2 @ W3 + b3.
    f = (jnp.dot(h, wh_ref[0], preferred_element_type=f32)
         + jnp.dot(a, w2b_ref[...], preferred_element_type=f32)
         + b[1:2, :])

    # layers[4]: ReLU
    f = jnp.maximum(f, 0.0).astype(cdt)
    # layers[5]: Linear(hidden, hidden)
    f = jnp.dot(f, wh_ref[1], preferred_element_type=f32) + b[2:3, :]
    # layers[6]: ReLU
    f = jnp.maximum(f, 0.0).astype(cdt)
    # layers[7]: Linear(hidden, out_channels)  (weight padded to P lanes)
    o = jnp.dot(f, wh_ref[2], preferred_element_type=f32) + b[3:4, :]

    # Store only the real out_channels lanes (no padded HBM writeback).
    out_ref[...] = o[:, :c_out].astype(out_ref.dtype)


# ---------------------------------------------------------------------------
# One-time parameter preparation (fold, pad, stack, cast)
# ---------------------------------------------------------------------------
def prepare_deal_predictor_params(params, compute_dtype=jnp.bfloat16):
    """Prepare weights once; reuse the result for every deal_predictor call."""
    f32 = jnp.float32
    c_in, hidden = params["w0"].shape
    a_dim = params["w2b"].shape[0]
    c_out = params["w7"].shape[1]
    P = _round_up(max(hidden, c_out, LANE), LANE)

    # Fold layers[2] and layers[3] (Linear->Linear with no ReLU between).
    w23a = params["w2a"].astype(f32) @ params["w3"].astype(f32)
    w23b = params["w2b"].astype(f32) @ params["w3"].astype(f32)
    b23 = params["b2"].astype(f32) @ params["w3"].astype(f32) + params["b3"].astype(f32)

    def pad2(w, rows, cols):
        return jnp.pad(w.astype(f32), ((0, rows - w.shape[0]), (0, cols - w.shape[1])))

    w0p = pad2(params["w0"], c_in, P).astype(compute_dtype)
    w2bp = pad2(w23b, a_dim, P).astype(compute_dtype)
    wh = jnp.stack([pad2(w23a, P, P),        # folded W2a@W3
                    pad2(params["w5"], P, P),
                    pad2(params["w7"], P, P)]).astype(compute_dtype)

    # All bias rows in one (8, P) f32 tile (single DMA).
    b_stack = jnp.zeros((SUBLANE, P), f32)
    b_stack = b_stack.at[0, :hidden].set(params["b0"].reshape(-1).astype(f32))
    b_stack = b_stack.at[1, :hidden].set(b23.reshape(-1))
    b_stack = b_stack.at[2, :hidden].set(params["b5"].reshape(-1).astype(f32))
    b_stack = b_stack.at[3, :c_out].set(params["b7"].reshape(-1).astype(f32))

    return {"w0p": w0p, "w2bp": w2bp, "wh": wh, "b_stack": b_stack,
            "c_in": c_in, "a_dim": a_dim, "c_out": c_out, "P": P}


# ---------------------------------------------------------------------------
# Wrapper
# ---------------------------------------------------------------------------
def deal_predictor(x, addr, prep, *, tb=4096,
                   vmem_limit_bytes=32 * 1024 * 1024):
    B, c_in = x.shape
    a_dim = addr.shape[1]
    assert c_in == prep["c_in"] and a_dim == prep["a_dim"]
    c_out, P = prep["c_out"], prep["P"]
    w_itemsize = jnp.dtype(prep["w0p"].dtype).itemsize

    # Batch tile: large (amortizes ~0.35us/step pipeline overhead), rounded to
    # a multiple of 128 lanes; if B is between tb and 2*tb, split into two
    # roughly equal 128-aligned tiles so both v7x TensorCores get work.
    if B >= 2 * tb:
        tb_eff = tb
    else:
        half = _round_up(pl.cdiv(B, 2), LANE)
        tb_eff = half if half < B else B
    grid = (pl.cdiv(B, tb_eff),)

    flops = 2 * B * (c_in * P + a_dim * P + 3 * P * P)
    bytes_accessed = (B * (c_in + a_dim) * 4                 # f32 inputs
                      + B * c_out * 4                        # f32 output
                      + (c_in * P + a_dim * P + 3 * P * P) * w_itemsize
                      + SUBLANE * P * 4)                     # biases
    cost = pl.CostEstimate(flops=flops, transcendentals=0,
                           bytes_accessed=bytes_accessed)

    def const_spec(shape):
        return pl.BlockSpec(shape, lambda i, _n=len(shape): (0,) * _n)

    return pl.pallas_call(
        deal_predictor_kernel,
        out_shape=jax.ShapeDtypeStruct((B, c_out), jnp.float32),
        grid=grid,
        in_specs=[
            pl.BlockSpec((tb_eff, c_in), lambda i: (i, 0)),    # x tile (f32)
            pl.BlockSpec((tb_eff, a_dim), lambda i: (i, 0)),   # addr tile (f32)
            const_spec((c_in, P)),        # w0 (padded cols)
            const_spec((a_dim, P)),       # folded W2b@W3 (padded cols)
            const_spec((3, P, P)),        # stacked [W2a@W3, W5, W7]
            const_spec((SUBLANE, P)),     # stacked biases
        ],
        out_specs=pl.BlockSpec((tb_eff, c_out), lambda i: (i, 0)),
        compiler_params=pltpu.CompilerParams(
            dimension_semantics=("parallel",),
            vmem_limit_bytes=vmem_limit_bytes,
        ),
        cost_estimate=cost,
    )(x, addr, prep["w0p"], prep["w2bp"], prep["wh"], prep["b_stack"])


# ---------------------------------------------------------------------------
# Pure-JAX reference (torch-faithful structure, unfolded layers, same
# bf16-input / f32-accumulate quantization as the kernel)
# ---------------------------------------------------------------------------
def reference(x, addr, p, compute_dtype=jnp.bfloat16):
    f32 = jnp.float32
    cdt = compute_dtype

    def lin(v, w, b):
        return jnp.dot(v.astype(cdt), w.astype(cdt),
                       preferred_element_type=f32) + b.astype(f32)

    h = lin(x, p["w0"], p["b0"])                                  # layers[0]
    f = jnp.concatenate([h, addr.astype(f32)], axis=1)
    f = jnp.maximum(f, 0.0)                                       # layers[1]
    w2 = jnp.concatenate([p["w2a"], p["w2b"]], axis=0)
    f = lin(f, w2, p["b2"])                                       # layers[2]
    f = lin(f, p["w3"], p["b3"])                                  # layers[3]
    f = jnp.maximum(f, 0.0)                                       # layers[4]
    f = lin(f, p["w5"], p["b5"])                                  # layers[5]
    f = jnp.maximum(f, 0.0)                                       # layers[6]
    return lin(f, p["w7"], p["b7"])                               # layers[7]


def init_params(key, c_in, hidden, c_out, addr_dim):
    ks = jax.random.split(key, 12)
    scale = 0.1

    def w(k, shape):
        return (scale * jax.random.normal(k, shape)).astype(jnp.float32)

    return {
        "w0":  w(ks[0], (c_in, hidden)),    "b0": w(ks[1], (1, hidden)),
        "w2a": w(ks[2], (hidden, hidden)),  "w2b": w(ks[3], (addr_dim, hidden)),
        "b2":  w(ks[4], (1, hidden)),
        "w3":  w(ks[5], (hidden, hidden)),  "b3": w(ks[6], (1, hidden)),
        "w5":  w(ks[7], (hidden, hidden)),  "b5": w(ks[8], (1, hidden)),
        "w7":  w(ks[9], (hidden, c_out)),   "b7": w(ks[10], (1, c_out)),
    }


if __name__ == "__main__":
    # Small shapes consistent with the module (num_layers=5 default).
    B, C_IN, HIDDEN, ADDR, C_OUT = 64, 16, 32, 16, 8

    key = jax.random.PRNGKey(0)
    k_x, k_a, k_p = jax.random.split(key, 3)

    deals_numerical_features = jax.random.normal(k_x, (B, C_IN), dtype=jnp.float32)
    deals_address_embedding = jax.random.normal(k_a, (B, ADDR), dtype=jnp.float32)
    params = init_params(k_p, C_IN, HIDDEN, C_OUT, ADDR)

    # One-time weight prep (fold layers[2]+[3], pad, stack, bf16 cast).
    prep = prepare_deal_predictor_params(params, compute_dtype=jnp.bfloat16)

    out = deal_predictor(deals_numerical_features, deals_address_embedding, prep)
    out = jax.block_until_ready(out)

    ref = reference(deals_numerical_features, deals_address_embedding, params)
    err = float(jnp.max(jnp.abs(out - ref)))
    assert out.shape == (B, C_OUT)
    assert jnp.allclose(out, ref, atol=2e-3, rtol=1e-2), f"mismatch vs reference (max abs err {err})"

    print("KERNEL_OK")
</pallas_src>

<mosaic_0001>
module attributes {stable_mosaic.version = 11 : i64} {
  func.func @deal_predictor_kernel(%arg0: i32, %arg1: memref<64x16xf32, #tpu.memory_space<vmem>>, %arg2: memref<64x16xf32, #tpu.memory_space<vmem>>, %arg3: memref<16x128xbf16, #tpu.memory_space<vmem>>, %arg4: memref<16x128xbf16, #tpu.memory_space<vmem>>, %arg5: memref<3x128x128xbf16, #tpu.memory_space<vmem>>, %arg6: memref<8x128xf32, #tpu.memory_space<vmem>>, %arg7: memref<64x8xf32, #tpu.memory_space<vmem>>) attributes {dimension_semantics = [#tpu.dimension_semantics<parallel>], iteration_bounds = array<i64: 1>, scalar_prefetch = 0 : i64, scratch_operands = 0 : i64, tpu.core_type = #tpu.core_type<tc>, window_params = [{transform_indices = @transform_0, window_bounds = array<i64: 64, 16>}, {transform_indices = @transform_1, window_bounds = array<i64: 64, 16>}, {pipeline_mode = #tpu.pipeline_mode<synchronous>, transform_indices = @transform_2, window_bounds = array<i64: 16, 128>}, {pipeline_mode = #tpu.pipeline_mode<synchronous>, transform_indices = @transform_3, window_bounds = array<i64: 16, 128>}, {pipeline_mode = #tpu.pipeline_mode<synchronous>, transform_indices = @transform_4, window_bounds = array<i64: 3, 128, 128>}, {pipeline_mode = #tpu.pipeline_mode<synchronous>, transform_indices = @transform_5, window_bounds = array<i64: 8, 128>}, {transform_indices = @transform_6, window_bounds = array<i64: 64, 8>}]} {
    %c0 = arith.constant 0 : index
    %c0_0 = arith.constant 0 : index
    %0 = vector.load %arg1[%c0, %c0_0] : memref<64x16xf32, #tpu.memory_space<vmem>>, vector<64x16xf32>
    %1 = arith.truncf %0 : vector<64x16xf32> to vector<64x16xbf16>
    %c0_1 = arith.constant 0 : index
    %c0_2 = arith.constant 0 : index
    %2 = vector.load %arg2[%c0_1, %c0_2] : memref<64x16xf32, #tpu.memory_space<vmem>>, vector<64x16xf32>
    %c0_3 = arith.constant 0 : index
    %c0_4 = arith.constant 0 : index
    %3 = vector.load %arg6[%c0_3, %c0_4] : memref<8x128xf32, #tpu.memory_space<vmem>>, vector<8x128xf32>
    %c0_5 = arith.constant 0 : index
    %c0_6 = arith.constant 0 : index
    %4 = vector.load %arg3[%c0_5, %c0_6] : memref<16x128xbf16, #tpu.memory_space<vmem>>, vector<16x128xbf16>
    %cst = arith.constant dense<0.000000e+00> : vector<64x128xf32>
    %5 = tpu.matmul %1, %4, %cst {dimension_numbers = #tpu.dot_dimension_numbers<[1], [0], [0], [1], [0, 0, 1, 1], [], []>} : vector<64x16xbf16>, vector<16x128xbf16>, vector<64x128xf32> -> vector<64x128xf32>
    %6 = vector.extract_strided_slice %3 {offsets = [0, 0], sizes = [1, 128], strides = [1, 1]} : vector<8x128xf32> to vector<1x128xf32>
    %7 = vector.broadcast %6 : vector<1x128xf32> to vector<64x128xf32>
    %8 = arith.addf %5, %7 : vector<64x128xf32>
    %cst_7 = arith.constant 0.000000e+00 : f32
    %9 = vector.broadcast %cst_7 : f32 to vector<64x128xf32>
    %10 = arith.maximumf %8, %9 : vector<64x128xf32>
    %11 = arith.truncf %10 : vector<64x128xf32> to vector<64x128xbf16>
    %cst_8 = arith.constant 0.000000e+00 : f32
    %12 = vector.broadcast %cst_8 : f32 to vector<64x16xf32>
    %13 = arith.maximumf %2, %12 : vector<64x16xf32>
    %14 = arith.truncf %13 : vector<64x16xf32> to vector<64x16xbf16>
    %c0_9 = arith.constant 0 : index
    %c0_10 = arith.constant 0 : index
    %c0_11 = arith.constant 0 : index
    %15 = vector.load %arg5[%c0_9, %c0_10, %c0_11] : memref<3x128x128xbf16, #tpu.memory_space<vmem>>, vector<1x128x128xbf16>
    %16 = vector.shape_cast %15 : vector<1x128x128xbf16> to vector<128x128xbf16>
    %cst_12 = arith.constant dense<0.000000e+00> : vector<64x128xf32>
    %17 = tpu.matmul %11, %16, %cst_12 {dimension_numbers = #tpu.dot_dimension_numbers<[1], [0], [0], [1], [0, 0, 1, 1], [], []>} : vector<64x128xbf16>, vector<128x128xbf16>, vector<64x128xf32> -> vector<64x128xf32>
    %c0_13 = arith.constant 0 : index
    %c0_14 = arith.constant 0 : index
    %18 = vector.load %arg4[%c0_13, %c0_14] : memref<16x128xbf16, #tpu.memory_space<vmem>>, vector<16x128xbf16>
    %cst_15 = arith.constant dense<0.000000e+00> : vector<64x128xf32>
    %19 = tpu.matmul %14, %18, %cst_15 {dimension_numbers = #tpu.dot_dimension_numbers<[1], [0], [0], [1], [0, 0, 1, 1], [], []>} : vector<64x16xbf16>, vector<16x128xbf16>, vector<64x128xf32> -> vector<64x128xf32>
    %20 = arith.addf %17, %19 : vector<64x128xf32>
    %21 = vector.extract_strided_slice %3 {offsets = [1, 0], sizes = [1, 128], strides = [1, 1]} : vector<8x128xf32> to vector<1x128xf32>
    %22 = vector.broadcast %21 : vector<1x128xf32> to vector<64x128xf32>
    %23 = arith.addf %20, %22 : vector<64x128xf32>
    %cst_16 = arith.constant 0.000000e+00 : f32
    %24 = vector.broadcast %cst_16 : f32 to vector<64x128xf32>
    %25 = arith.maximumf %23, %24 : vector<64x128xf32>
    %26 = arith.truncf %25 : vector<64x128xf32> to vector<64x128xbf16>
    %c1 = arith.constant 1 : index
    %c0_17 = arith.constant 0 : index
    %c0_18 = arith.constant 0 : index
    %27 = vector.load %arg5[%c1, %c0_17, %c0_18] : memref<3x128x128xbf16, #tpu.memory_space<vmem>>, vector<1x128x128xbf16>
    %28 = vector.shape_cast %27 : vector<1x128x128xbf16> to vector<128x128xbf16>
    %cst_19 = arith.constant dense<0.000000e+00> : vector<64x128xf32>
    %29 = tpu.matmul %26, %28, %cst_19 {dimension_numbers = #tpu.dot_dimension_numbers<[1], [0], [0], [1], [0, 0, 1, 1], [], []>} : vector<64x128xbf16>, vector<128x128xbf16>, vector<64x128xf32> -> vector<64x128xf32>
    %30 = vector.extract_strided_slice %3 {offsets = [2, 0], sizes = [1, 128], strides = [1, 1]} : vector<8x128xf32> to vector<1x128xf32>
    %31 = vector.broadcast %30 : vector<1x128xf32> to vector<64x128xf32>
    %32 = arith.addf %29, %31 : vector<64x128xf32>
    %cst_20 = arith.constant 0.000000e+00 : f32
    %33 = vector.broadcast %cst_20 : f32 to vector<64x128xf32>
    %34 = arith.maximumf %32, %33 : vector<64x128xf32>
    %35 = arith.truncf %34 : vector<64x128xf32> to vector<64x128xbf16>
    %c2 = arith.constant 2 : index
    %c0_21 = arith.constant 0 : index
    %c0_22 = arith.constant 0 : index
    %36 = vector.load %arg5[%c2, %c0_21, %c0_22] : memref<3x128x128xbf16, #tpu.memory_space<vmem>>, vector<1x128x128xbf16>
    %37 = vector.shape_cast %36 : vector<1x128x128xbf16> to vector<128x128xbf16>
    %cst_23 = arith.constant dense<0.000000e+00> : vector<64x128xf32>
    %38 = tpu.matmul %35, %37, %cst_23 {dimension_numbers = #tpu.dot_dimension_numbers<[1], [0], [0], [1], [0, 0, 1, 1], [], []>} : vector<64x128xbf16>, vector<128x128xbf16>, vector<64x128xf32> -> vector<64x128xf32>
    %39 = vector.extract_strided_slice %3 {offsets = [3, 0], sizes = [1, 128], strides = [1, 1]} : vector<8x128xf32> to vector<1x128xf32>
    %40 = vector.broadcast %39 : vector<1x128xf32> to vector<64x128xf32>
    %41 = arith.addf %38, %40 : vector<64x128xf32>
    %42 = vector.extract_strided_slice %41 {offsets = [0, 0], sizes = [64, 8], strides = [1, 1]} : vector<64x128xf32> to vector<64x8xf32>
    %c0_24 = arith.constant 0 : index
    %c0_25 = arith.constant 0 : index
    %43 = vector.load %arg7[%c0_24, %c0_25] : memref<64x8xf32, #tpu.memory_space<vmem>>, vector<64x8xf32>
    tpu.vector_store %arg7[%c0_24, %c0_25], %42 {strides = array<i32>} : memref<64x8xf32, #tpu.memory_space<vmem>>, vector<64x8xf32>,
    return
  }
  func.func @transform_0(%arg0: i32) -> (i32, i32) {
    %c0_i32 = arith.constant 0 : i32
    %c0_i32_0 = arith.constant 0 : i32
    return %arg0, %c0_i32 : i32, i32
  }
  func.func @transform_1(%arg0: i32) -> (i32, i32) {
    %c0_i32 = arith.constant 0 : i32
    %c0_i32_0 = arith.constant 0 : i32
    return %arg0, %c0_i32 : i32, i32
  }
  func.func @transform_2(%arg0: i32) -> (i32, i32) {
    %c0_i32 = arith.constant 0 : i32
    %c0_i32_0 = arith.constant 0 : i32
    %c0_i32_1 = arith.constant 0 : i32
    return %c0_i32, %c0_i32_0 : i32, i32
  }
  func.func @transform_3(%arg0: i32) -> (i32, i32) {
    %c0_i32 = arith.constant 0 : i32
    %c0_i32_0 = arith.constant 0 : i32
    %c0_i32_1 = arith.constant 0 : i32
    return %c0_i32, %c0_i32_0 : i32, i32
  }
  func.func @transform_4(%arg0: i32) -> (i32, i32, i32) {
    %c0_i32 = arith.constant 0 : i32
    %c0_i32_0 = arith.constant 0 : i32
    %c0_i32_1 = arith.constant 0 : i32
    %c0_i32_2 = arith.constant 0 : i32
    return %c0_i32, %c0_i32_0, %c0_i32_1 : i32, i32, i32
  }
  func.func @transform_5(%arg0: i32) -> (i32, i32) {
    %c0_i32 = arith.constant 0 : i32
    %c0_i32_0 = arith.constant 0 : i32
    %c0_i32_1 = arith.constant 0 : i32
    return %c0_i32, %c0_i32_0 : i32, i32
  }
  func.func @transform_6(%arg0: i32) -> (i32, i32) {
    %c0_i32 = arith.constant 0 : i32
    %c0_i32_0 = arith.constant 0 : i32
    return %arg0, %c0_i32 : i32, i32
  }
}

</mosaic_0001>

<bundles_post_ra>
// kernel: tpu_custom_call.1
= control target key start
LH: loop header
LB: loop body
LE: loop exit
PB: predicated region body
PF: predicated region fallthrough
CT: control target
= control target key end

     0   :  { %11 = vsyncpa [#allocation3], 0  ;;  %s954_s21 = smov [#allocation2]   ;;  %s1113_s0 = inlined_call_operand.vmem [shape: f32[64,16], index: 0, kind: input, shape index: {}]   ;;  %s1114_s1 = inlined_call_operand.vmem [shape: f32[64,16], index: 1, kind: input, shape index: {}]   ;;  %s1115_s2 = inlined_call_operand.vmem [shape: bf16[16,128], index: 2, kind: input, shape index: {}]   ;;  %s1116_s3 = inlined_call_operand.vmem [shape: bf16[16,128], index: 3, kind: input, shape index: {}]   ;;  %s1117_s4 = inlined_call_operand.hbm [shape: bf16[3,128,128], index: 4, kind: input, shape index: {}]   ;;  %s1118_s5 = inlined_call_operand.vmem [shape: f32[8,128], index: 5, kind: input, shape index: {}]   ;;  %s1119_s6 = inlined_call_operand.vmem [shape: f32[64,8], index: 6, kind: output, shape index: {}]  }
   0x1   :  { %s25_s22 = sshll.u32 %s954_s21, 4  ;;  %s930_s25 = scalar_lea.hbm %s1117_s4, 3072  ;;  %s26_s22 = int_to_ptr.vmem [resolvable:$true] %s25_s22 }
   0x2   :  { %p931_p0 = scmp.ne.s32.totalorder %s1117_s4, %s930_s25  ;;  %p934_p1 = scmp.lt.u32.totalorder %s930_s25, %s1117_s4 }
   0x4   :  { %p936_p2 = pnand %p934_p1, %p931_p0 }
   0x6   :  { %939 = shalt.err (!%p936_p2)
}
   0x7   :  { %s940_s30 = scalar_lea.vmem %s26_s22, 3072  ;;  %p945_p4 = scmp.lt.s32.totalorder %s26_s22, %s26_s22 }
   0x8   :  { %p941_p3 = scmp.ne.s32.totalorder %s26_s22, %s940_s30  ;;  %p946_p5 = scmp.lt.s32.totalorder %s940_s30, %s940_s30 }
   0xa   :  { %p947_p6 = por %p946_p5, %p945_p4 }
   0xc   :  { %p948_p7 = pnand %p947_p6, %p941_p3 }
   0xe   :  { %951 = shalt.err (!%p948_p7)
}
   0xf   :  { %s955_s7 = smov 64   ;;  %s956_s8 = smov 4  }
  0x10   :  { %31 = dma.hbm_to_vmem [thread:$0]  %s1117_s4, 3072, %s26_s22, [#allocation3], %s955_s7, %s955_s7, %s956_s8  }
  0x11   :  { %952 = dma.done.wait [#allocation3], 3072  }
  0x12   :  { %953 = vsyncadd [#allocation3], 4294964224  ;;  %v904_v0 = vld [vmem:[%s1115_s2] sm:$0xff]   ;;  %v39_v2 = vld [vmem:[%s1113_s0 + $0x8] sm:$0xff]  ;;  %vm71_vm0 = vcmask 130048   ;;  %v61_v48 = vlaneseq  ;;  %vm691_vm1 = vcmask 64512  }
  0x13   :  { %v38_v1 = vld [vmem:[%s1113_s0] sm:$0xff]  ;;  %v40_v3 = vld [vmem:[%s1113_s0 + $0x10] sm:$0xff]  ;;  %785 = vmatprep.subr.bf16.mxu0 %v904_v0  ;;  %v41_v5 = vld [vmem:[%s1113_s0 + $0x18] sm:$0xff] }
  0x14   :  { %v46_v4 = vpack.c.bf16 %v39_v2, %v38_v1  ;;  %v42_v6 = vld [vmem:[%s1113_s0 + $0x20] sm:$0xff]  ;;  %v43_v7 = vld [vmem:[%s1113_s0 + $0x28] sm:$0xff]  ;;  %786 = vmatpush3.bf16.msra.mxu0 %v904_v0  ;;  %v47_v8 = vpack.c.bf16 %v41_v5, %v40_v3  ;;  %v44_v12 = vld [vmem:[%s1113_s0 + $0x30] sm:$0xff]  ;;  %v1066_v49 = vshrl.u32 %v61_v48, 7 }
  0x15   :  { %v48_v9 = vpack.c.bf16 %v43_v7, %v42_v6  ;;  %v905_v10 = vld [vmem:[%s1116_s3] sm:$0xff]   ;;  %v45_v13 = vld [vmem:[%s1113_s0 + $0x38] sm:$0xff]  ;;  %v51_v14 = vld [vmem:[%s1114_s1 + $0x8] sm:$0xff] }
  0x16   :  { %787 = vmatprep.mubr.msk.bf16.mxu0 %vm71_vm0, %v46_v4  ;;  %v50_v11 = vld [vmem:[%s1114_s1] sm:$0xff]  ;;  %795 = vmatprep.subr.bf16.mxu1 %v905_v10  ;;  %v162_v16 = vmax.f32 %v51_v14, 0.0  ;;  %v52_v18 = vld [vmem:[%s1114_s1 + $0x10] sm:$0xff]  ;;  %v53_v19 = vld [vmem:[%s1114_s1 + $0x18] sm:$0xff]  ;;  %v49_v25 = vpack.c.bf16 %v45_v13, %v44_v12  ;;  %v63_v50 = vsub.s32 0, %v1066_v49 }
  0x17   :  { %v161_v15 = vmax.f32 %v50_v11, 0.0  ;;  %788 = vmatmul.mubr.msk.bf16.vlgmr.msra.gmra.mrb[0].mxu0 %vm71_vm0, %v47_v8  ;;  %v906_v17 = vld [vmem:[#allocation2] sm:$0xff]   ;;  %796 = vmatpush3.bf16.msra.mxu1 %v905_v10  ;;  %v163_v20 = vmax.f32 %v52_v18, 0.0  ;;  %v164_v21 = vmax.f32 %v53_v19, 0.0  ;;  %v907_v24 = vld [vmem:[#allocation2 + $0x8] sm:$0xff]   ;;  %v908_v26 = vld [vmem:[#allocation2 + $0x10] sm:$0xff]  }
  0x18   :  { %791 = vmatprep.mubr.msk.bf16.mxu0 %vm71_vm0, %v48_v9  ;;  %805 = vmatprep.subr.bf16.mxu1 %v906_v17  ;;  %v909_v27 = vld [vmem:[#allocation2 + $0x18] sm:$0xff]   ;;  %v910_v28 = vld [vmem:[#allocation2 + $0x20] sm:$0xff]   ;;  %v911_v29 = vld [vmem:[#allocation2 + $0x28] sm:$0xff]  }
  0x19   :  { %v169_v22 = vpack.c.bf16 %v162_v16, %v161_v15  ;;  %v170_v23 = vpack.c.bf16 %v164_v21, %v163_v20  ;;  %v54_v30 = vld [vmem:[%s1114_s1 + $0x20] sm:$0xff]  ;;  %v55_v31 = vld [vmem:[%s1114_s1 + $0x28] sm:$0xff]  ;;  %v56_v34 = vld [vmem:[%s1114_s1 + $0x30] sm:$0xff] }
  0x1a   :  { %v165_v32 = vmax.f32 %v54_v30, 0.0  ;;  %v166_v33 = vmax.f32 %v55_v31, 0.0  ;;  %v57_v35 = vld [vmem:[%s1114_s1 + $0x38] sm:$0xff]  ;;  %v167_v36 = vmax.f32 %v56_v34, 0.0  ;;  %v912_v40 = vld [vmem:[#allocation2 + $0x30] sm:$0xff]   ;;  %v914_v42 = vld [vmem:[#allocation2 + $0x40] sm:$0xff]  }
  0x1b   :  { %797 = vmatprep.mubr.msk.bf16.mxu1 %vm71_vm0, %v169_v22  ;;  %v168_v37 = vmax.f32 %v57_v35, 0.0  ;;  %v913_v41 = vld [vmem:[#allocation2 + $0x38] sm:$0xff]   ;;  %v915_v43 = vld [vmem:[#allocation2 + $0x48] sm:$0xff]   ;;  %829 = vmatprep.subr.bf16.mxu0 %v914_v42  ;;  %v916_v44 = vld [vmem:[#allocation2 + $0x50] sm:$0xff]  }
  0x1c   :  { %798 = vmatmul.mubr.msk.bf16.vlgmr.msra.gmra.mrb[0].mxu1 %vm71_vm0, %v170_v23  ;;  %v171_v38 = vpack.c.bf16 %v166_v33, %v165_v32  ;;  %830 = vmatpush3.bf16.msra.mxu0 %v914_v42  ;;  %v917_v45 = vld [vmem:[#allocation2 + $0x58] sm:$0xff]   ;;  %v918_v46 = vld [vmem:[#allocation2 + $0x60] sm:$0xff]   ;;  %v919_v47 = vld [vmem:[#allocation2 + $0x68] sm:$0xff]  }
  0x1d   :  { %806 = vmatpush3.bf16.msra.mxu1 %v906_v17  ;;  %v172_v39 = vpack.c.bf16 %v168_v37, %v167_v36  ;;  %831 = vmatprep.subr.bf16.mxu0 %v915_v43  ;;  %v1072_v51 = vld [vmem:[%s1118_s5] sm:$0xff]  ;;  %v920_v17 = vld [vmem:[#allocation2 + $0x70] sm:$0xff]   ;;  %v921_v18 = vld [vmem:[#allocation2 + $0x78] sm:$0xff]  }
  0x1e   :  { %807 = vmatprep.subr.bf16.mxu1 %v907_v24  ;;  %801 = vmatprep.mubr.msk.bf16.mxu1 %vm71_vm0, %v171_v38  ;;  %v64_v52 = vrot.slane %v1072_v51, %v63_v50  ;;  %v922_v19 = vld [vmem:[#allocation2 + $0x80] sm:$0xff]   ;;  %v923_v20 = vld [vmem:[#allocation2 + $0x88] sm:$0xff]   ;;  %v924_v21 = vld [vmem:[#allocation2 + $0x90] sm:$0xff]  }
  0x1f   :  { %792 = vmatmul.mubr.msk.bf16.gmra.mrb[4].mxu0 %vm71_vm0, %v49_v25  ;;  %v925_v22 = vld [vmem:[#allocation2 + $0x98] sm:$0xff]   ;;  %v926_v23 = vld [vmem:[#allocation2 + $0xa0] sm:$0xff]   ;;  %v389_v25 = vsub.s32 1, %v1066_v49 }
  0x20   :  { %832 = vmatpush3.bf16.msra.mxu0 %v915_v43 }
  0x21   :  { %808 = vmatpush3.bf16.msra.mxu1 %v907_v24  ;;  %833 = vmatprep.subr.bf16.mxu0 %v916_v44  ;;  %v927_v24 = vld [vmem:[#allocation2 + $0xa8] sm:$0xff]  }
  0x22   :  { %809 = vmatprep.subr.bf16.mxu1 %v908_v26 }
  0x24   :  { %802 = vmatmul.mubr.msk.bf16.gmra.mrb[4].mxu1 %vm71_vm0, %v172_v39  ;;  %834 = vmatpush3.bf16.msra.mxu0 %v916_v44 }
  0x25   :  { %810 = vmatpush3.bf16.msra.mxu1 %v908_v26  ;;  %835 = vmatprep.subr.bf16.mxu0 %v917_v45  ;;  %v390_v26 = vrot.slane %v1072_v51, %v389_v25  ;;  %v576_v25 = vsub.s32 3, %v1066_v49 }
  0x26   :  { %811 = vmatprep.subr.bf16.mxu1 %v909_v27 }
  0x28   :  { %836 = vmatpush3.bf16.msra.mxu0 %v917_v45 }
  0x29   :  { %812 = vmatpush3.bf16.msra.mxu1 %v909_v27  ;;  %837 = vmatprep.subr.bf16.mxu0 %v918_v46 }
  0x2a   :  { %813 = vmatprep.subr.bf16.mxu1 %v910_v28 }
  0x2c   :  { %838 = vmatpush3.bf16.msra.mxu0 %v918_v46 }
  0x2d   :  { %814 = vmatpush3.bf16.msra.mxu1 %v910_v28  ;;  %839 = vmatprep.subr.bf16.mxu0 %v919_v47 }
  0x2e   :  { %815 = vmatprep.subr.bf16.mxu1 %v911_v29 }
  0x30   :  { %840 = vmatpush3.bf16.msra.mxu0 %v919_v47 }
  0x31   :  { %816 = vmatpush3.bf16.msra.mxu1 %v911_v29  ;;  %841 = vmatprep.subr.bf16.mxu0 %v920_v17 }
  0x32   :  { %817 = vmatprep.subr.bf16.mxu1 %v912_v40 }
  0x34   :  { %842 = vmatpush3.bf16.msra.mxu0 %v920_v17 }
  0x35   :  { %818 = vmatpush3.bf16.msra.mxu1 %v912_v40  ;;  %843 = vmatprep.subr.bf16.mxu0 %v921_v18 }
  0x36   :  { %819 = vmatprep.subr.bf16.mxu1 %v913_v41 }
  0x38   :  { %844 = vmatpush3.bf16.msra.mxu0 %v921_v18 }
  0x39   :  { %820 = vmatpush3.bf16.msra.mxu1 %v913_v41  ;;  %853 = vmatprep.subr.bf16.mxu0 %v922_v19 }
  0x3a   :  { %877 = vmatprep.subr.bf16.mxu1 %v922_v19 }
  0xea   :  { %v789_v53 = vpop.f32.mrb[0].mxu0 }
  0xeb   :  { %v127_v54 = vadd.f32 %v789_v53, %v64_v52  ;;  %v118_v55 = vpop.f32.mrb[1].mxu0 }
  0xec   :  { %v119_v56 = vadd.f32 %v118_v55, %v64_v52  ;;  %v790_v57 = vpop.f32.mrb[2].mxu0 }
  0xed   :  { %v130_v58 = vadd.f32 %v790_v57, %v64_v52  ;;  %v121_v59 = vpop.f32.mrb[3].mxu0  ;;  %v151_v61 = vmax.f32 %v127_v54, 0.0  ;;  %v928_v57 = vld [vmem:[#allocation2 + $0xb0] sm:$0xff]  }
  0xee   :  { %v122_v60 = vadd.f32 %v121_v59, %v64_v52  ;;  %v149_v63 = vmax.f32 %v119_v56, 0.0  ;;  %v430_v59 = vsub.s32 2, %v1066_v49 }
  0xef   :  { %v152_v62 = vmax.f32 %v130_v58, 0.0  ;;  %v929_v58 = vld [vmem:[#allocation2 + $0xb8] sm:$0xff]  }
  0xf0   :  { %v150_v0 = vmax.f32 %v122_v60, 0.0  ;;  %v431_v60 = vrot.slane %v1072_v51, %v430_v59 }
  0xf1   :  { %v158_v1 = vpack.c.bf16 %v152_v62, %v151_v61 }
  0xf2   :  { %v157_v2 = vpack.c.bf16 %v150_v0, %v149_v63  ;;  %v793_v3 = vpop.f32.mrb[4].mxu0 }
  0xf3   :  { %v143_v4 = vadd.f32 %v793_v3, %v64_v52  ;;  %v134_v5 = vpop.f32.mrb[5].mxu0 }
  0xf4   :  { %v135_v6 = vadd.f32 %v134_v5, %v64_v52  ;;  %v794_v7 = vpop.f32.mrb[6].mxu0  ;;  %821 = vmatprep.mubr.bf16.mxu1 %v157_v2 }
  0xf5   :  { %v146_v8 = vadd.f32 %v794_v7, %v64_v52  ;;  %v137_v9 = vpop.f32.mrb[7].mxu0  ;;  %822 = vmatmul.mubr.bf16.vlgmr.msra.gmra.mrb[0].mxu1 %v158_v1  ;;  %v155_v11 = vmax.f32 %v143_v4, 0.0 }
  0xf6   :  { %v138_v10 = vadd.f32 %v137_v9, %v64_v52  ;;  %v153_v13 = vmax.f32 %v135_v6, 0.0  ;;  %885 = vmatpush3.bf16.msra.mxu1 %v922_v19 }
  0xf7   :  { %v156_v12 = vmax.f32 %v146_v8, 0.0  ;;  %878 = vmatprep.subr.bf16.mxu1 %v923_v20 }
  0xf8   :  { %v154_v14 = vmax.f32 %v138_v10, 0.0 }
  0xf9   :  { %v160_v15 = vpack.c.bf16 %v156_v12, %v155_v11 }
  0xfa   :  { %v159_v16 = vpack.c.bf16 %v154_v14, %v153_v13  ;;  %886 = vmatpush3.bf16.msra.mxu1 %v923_v20 }
  0xfb   :  { %879 = vmatprep.subr.bf16.mxu1 %v924_v21 }
  0xfc   :  { %825 = vmatprep.mubr.bf16.mxu1 %v159_v16 }
  0xfd   :  { %826 = vmatmul.mubr.bf16.gmra.mrb[4].mxu1 %v160_v15 }
  0xfe   :  { %887 = vmatpush3.bf16.msra.mxu1 %v924_v21 }
  0xff   :  { %880 = vmatprep.subr.bf16.mxu1 %v925_v22 }
 0x102   :  { %888 = vmatpush3.bf16.msra.mxu1 %v925_v22 }
 0x103   :  { %881 = vmatprep.subr.bf16.mxu1 %v926_v23 }
 0x106   :  { %889 = vmatpush3.bf16.msra.mxu1 %v926_v23 }
 0x107   :  { %882 = vmatprep.subr.bf16.mxu1 %v927_v24 }
 0x10a   :  { %890 = vmatpush3.bf16.msra.mxu1 %v927_v24 }
 0x10b   :  { %883 = vmatprep.subr.bf16.mxu1 %v928_v57 }
 0x10e   :  { %891 = vmatpush3.bf16.msra.mxu1 %v928_v57 }
 0x10f   :  { %884 = vmatprep.subr.bf16.mxu1 %v929_v58 }
 0x112   :  { %892 = vmatpush3.bf16.msra.mxu1 %v929_v58 }
 0x1c8   :  { %v823_v27 = vpop.f32.mrb[0].mxu1 }
 0x1c9   :  { %v393_v28 = vadd.f32 %v823_v27, %v390_v26  ;;  %v356_v29 = vpop.f32.mrb[1].mxu1 }
 0x1ca   :  { %v391_v30 = vadd.f32 %v390_v26, %v356_v29  ;;  %v824_v31 = vpop.f32.mrb[2].mxu1 }
 0x1cb   :  { %v394_v32 = vadd.f32 %v824_v31, %v390_v26  ;;  %v359_v33 = vpop.f32.mrb[3].mxu1  ;;  %v401_v35 = vmax.f32 %v393_v28, 0.0 }
 0x1cc   :  { %v392_v34 = vadd.f32 %v390_v26, %v359_v33  ;;  %v399_v37 = vmax.f32 %v391_v30, 0.0 }
 0x1cd   :  { %v402_v36 = vmax.f32 %v394_v32, 0.0 }
 0x1ce   :  { %v400_v38 = vmax.f32 %v392_v34, 0.0 }
 0x1cf   :  { %v408_v39 = vpack.c.bf16 %v402_v36, %v401_v35 }
 0x1d0   :  { %v407_v40 = vpack.c.bf16 %v400_v38, %v399_v37  ;;  %v827_v41 = vpop.f32.mrb[4].mxu1 }
 0x1d1   :  { %v397_v42 = vadd.f32 %v827_v41, %v390_v26  ;;  %v372_v43 = vpop.f32.mrb[5].mxu1 }
 0x1d2   :  { %v395_v44 = vadd.f32 %v390_v26, %v372_v43  ;;  %v828_v45 = vpop.f32.mrb[6].mxu1  ;;  %845 = vmatprep.mubr.bf16.mxu0 %v407_v40 }
 0x1d3   :  { %v398_v46 = vadd.f32 %v828_v45, %v390_v26  ;;  %v375_v47 = vpop.f32.mrb[7].mxu1  ;;  %846 = vmatmul.mubr.bf16.vlgmr.msra.gmra.mrb[8].mxu0 %v408_v39  ;;  %v405_v50 = vmax.f32 %v397_v42, 0.0 }
 0x1d4   :  { %v396_v48 = vadd.f32 %v390_v26, %v375_v47  ;;  %854 = vmatpush3.bf16.msra.mxu0 %v922_v19  ;;  %v403_v53 = vmax.f32 %v395_v44, 0.0  ;;  %v577_v26 = vrot.slane %v1072_v51, %v576_v25 }
 0x1d5   :  { %v406_v52 = vmax.f32 %v398_v46, 0.0  ;;  %855 = vmatprep.subr.bf16.mxu0 %v923_v20 }
 0x1d6   :  { %v404_v54 = vmax.f32 %v396_v48, 0.0 }
 0x1d7   :  { %v410_v55 = vpack.c.bf16 %v406_v52, %v405_v50 }
 0x1d8   :  { %v409_v56 = vpack.c.bf16 %v404_v54, %v403_v53  ;;  %856 = vmatpush3.bf16.msra.mxu0 %v923_v20 }
 0x1d9   :  { %857 = vmatprep.subr.bf16.mxu0 %v924_v21 }
 0x1da   :  { %849 = vmatprep.mubr.bf16.mxu0 %v409_v56 }
 0x1db   :  { %850 = vmatmul.mubr.bf16.gmra.mrb[12].mxu0 %v410_v55 }
 0x1dc   :  { %858 = vmatpush3.bf16.msra.mxu0 %v924_v21 }
 0x1dd   :  { %859 = vmatprep.subr.bf16.mxu0 %v925_v22 }
 0x1e0   :  { %860 = vmatpush3.bf16.msra.mxu0 %v925_v22 }
 0x1e1   :  { %861 = vmatprep.subr.bf16.mxu0 %v926_v23 }
 0x1e4   :  { %862 = vmatpush3.bf16.msra.mxu0 %v926_v23 }
 0x1e5   :  { %863 = vmatprep.subr.bf16.mxu0 %v927_v24 }
 0x1e8   :  { %864 = vmatpush3.bf16.msra.mxu0 %v927_v24 }
 0x1e9   :  { %865 = vmatprep.subr.bf16.mxu0 %v928_v57 }
 0x1ec   :  { %866 = vmatpush3.bf16.msra.mxu0 %v928_v57 }
 0x1ed   :  { %867 = vmatprep.subr.bf16.mxu0 %v929_v58 }
 0x1f0   :  { %868 = vmatpush3.bf16.msra.mxu0 %v929_v58 }
 0x2a6   :  { %v847_v61 = vpop.f32.mrb[8].mxu0 }
 0x2a7   :  { %v523_v62 = vadd.f32 %v847_v61, %v431_v60  ;;  %v514_v63 = vpop.f32.mrb[9].mxu0 }
 0x2a8   :  { %v515_v0 = vadd.f32 %v514_v63, %v431_v60  ;;  %v848_v1 = vpop.f32.mrb[10].mxu0 }
 0x2a9   :  { %v526_v2 = vadd.f32 %v848_v1, %v431_v60  ;;  %v517_v3 = vpop.f32.mrb[11].mxu0  ;;  %v547_v5 = vmax.f32 %v523_v62, 0.0 }
 0x2aa   :  { %v518_v4 = vadd.f32 %v517_v3, %v431_v60  ;;  %v545_v7 = vmax.f32 %v515_v0, 0.0 }
 0x2ab   :  { %v548_v6 = vmax.f32 %v526_v2, 0.0 }
 0x2ac   :  { %v546_v8 = vmax.f32 %v518_v4, 0.0 }
 0x2ad   :  { %v554_v9 = vpack.c.bf16 %v548_v6, %v547_v5 }
 0x2ae   :  { %v553_v10 = vpack.c.bf16 %v546_v8, %v545_v7  ;;  %v851_v11 = vpop.f32.mrb[12].mxu0 }
 0x2af   :  { %v539_v12 = vadd.f32 %v851_v11, %v431_v60  ;;  %v530_v13 = vpop.f32.mrb[13].mxu0 }
 0x2b0   :  { %v531_v14 = vadd.f32 %v530_v13, %v431_v60  ;;  %v852_v15 = vpop.f32.mrb[14].mxu0  ;;  %869 = vmatprep.mubr.bf16.mxu0 %v553_v10 }
 0x2b1   :  { %v542_v16 = vadd.f32 %v852_v15, %v431_v60  ;;  %v533_v17 = vpop.f32.mrb[15].mxu0  ;;  %870 = vmatmul.mubr.bf16.vlgmr.msra.gmra.mrb[16].mxu0 %v554_v9  ;;  %v551_v19 = vmax.f32 %v539_v12, 0.0 }
 0x2b2   :  { %v534_v18 = vadd.f32 %v533_v17, %v431_v60  ;;  %v549_v21 = vmax.f32 %v531_v14, 0.0 }
 0x2b3   :  { %v552_v20 = vmax.f32 %v542_v16, 0.0 }
 0x2b4   :  { %v550_v22 = vmax.f32 %v534_v18, 0.0 }
 0x2b5   :  { %v556_v23 = vpack.c.bf16 %v552_v20, %v551_v19 }
 0x2b6   :  { %v555_v24 = vpack.c.bf16 %v550_v22, %v549_v21 }
 0x2b8   :  { %873 = vmatprep.mubr.bf16.mxu1 %v555_v24 }
 0x2b9   :  { %874 = vmatmul.mubr.bf16.vlgmr.msra.gmra.mrb[8].mxu1 %v556_v23 }
 0x384   :  { %v871_v27 = vpop.f32.mrb[16].mxu0 }
 0x385   :  { %v669_v28 = vadd.f32 %v871_v27, %v577_v26  ;;  %v660_v29 = vpop.f32.mrb[17].mxu0 }
 0x386   :  { %v661_v30 = vadd.f32 %v660_v29, %v577_v26  ;;  %v872_v31 = vpop.f32.mrb[18].mxu0 }
 0x387   :  { %694 = vst.msk [vmem:[%s1119_s6 + $0x10] sm:$0xff] %vm691_vm1, %v669_v28  ;;  %v672_v32 = vadd.f32 %v872_v31, %v577_v26  ;;  %v663_v33 = vpop.f32.mrb[19].mxu0 }
 0x388   :  { %692 = vst.msk [vmem:[%s1119_s6] sm:$0xff] %vm691_vm1, %v661_v30  ;;  %v664_v49 = vadd.f32 %v663_v33, %v577_v26 }
 0x389   :  { %695 = vst.msk [vmem:[%s1119_s6 + $0x18] sm:$0xff] %vm691_vm1, %v672_v32 }
 0x38a   :  { %693 = vst.msk [vmem:[%s1119_s6 + $0x8] sm:$0xff] %vm691_vm1, %v664_v49 }
 0x38c   :  { %v875_v51 = vpop.f32.mrb[8].mxu1 }
 0x38d   :  { %v685_v34 = vadd.f32 %v875_v51, %v577_v26  ;;  %v676_v35 = vpop.f32.mrb[9].mxu1 }
 0x38e   :  { %v677_v36 = vadd.f32 %v676_v35, %v577_v26  ;;  %v876_v37 = vpop.f32.mrb[10].mxu1 }
 0x38f   :  { %698 = vst.msk [vmem:[%s1119_s6 + $0x30] sm:$0xff] %vm691_vm1, %v685_v34  ;;  %v688_v38 = vadd.f32 %v876_v37, %v577_v26  ;;  %v679_v39 = vpop.f32.mrb[11].mxu1 }
 0x390   :  { %696 = vst.msk [vmem:[%s1119_s6 + $0x20] sm:$0xff] %vm691_vm1, %v677_v36  ;;  %v680_v40 = vadd.f32 %v679_v39, %v577_v26 }
 0x391   :  { %699 = vst.msk [vmem:[%s1119_s6 + $0x38] sm:$0xff] %vm691_vm1, %v688_v38 }
 0x392   :  { %697 = vst.msk [vmem:[%s1119_s6 + $0x28] sm:$0xff] %vm691_vm1, %v680_v40 }
 0x393   :  { %704 = vsyncpa [#allocation3], 1 }

</bundles_post_ra>
